<compile_context>
chip_gen: v7x
topology: tpu7x:2x2x1
jax: 0.10.0
libtpu: 0.0.40
codegen_flags: <defaults>
</compile_context>

<pallas_src>
import jax
import jax.numpy as jnp
from jax.experimental import pallas as pl
from jax.experimental.pallas import tpu as pltpu

IN_F = 229   # fc1 in_features
H1 = 256     # fc1 out_features
H2 = 128     # fc2 out_features
OUT_F = 2    # fc3 out_features

TB_MAX = 2048  # batch-tile cap: ~10 MiB working set/tile, fits v7x's 64 MiB VMEM


def qnet_kernel(x_ref, w1_ref, b1_ref, w2_ref, b2_ref, w3_ref, b3_ref, o_ref):
    # fc1 + relu: cast the f32 input tile to bf16 in-kernel and contract over the
    # logical K=229 (Mosaic masks its internal lane padding), so no wrapper pad
    # pass and no reliance on physical-lane garbage being zero.
    xb = x_ref[...].astype(jnp.bfloat16)                               # (tb, 229)
    h1 = jnp.dot(xb, w1_ref[...], preferred_element_type=jnp.float32)  # (tb, 256)
    h1 = jnp.maximum(h1 + b1_ref[...], 0.0)
    # fc2 + relu
    h2 = jnp.dot(h1.astype(jnp.bfloat16), w2_ref[...],
                 preferred_element_type=jnp.float32)                   # (tb, 128)
    h2 = jnp.maximum(h2 + b2_ref[...], 0.0)
    # fc3: narrow (tb, 2) result -> only 8 useful bytes/row written back to HBM.
    # (MXU pass with N=2 is wasteful but fc3 is ~7% of FLOPs; not the bottleneck.)
    o_ref[...] = (jnp.dot(h2.astype(jnp.bfloat16), w3_ref[...],
                          preferred_element_type=jnp.float32) + b3_ref[...])


def _round_up(n, m):
    return ((n + m - 1) // m) * m


def _choose_batch_tiling(B, tb_max):
    """Balanced batch tiles; >=2 grid steps for B >= 32 so v7x's 2 TCs both work."""
    nt = pl.cdiv(B, tb_max)
    if B >= 32:
        nt = max(nt, 2)
    if nt <= 1:
        # Single full-extent block: block dims == array dims, no alignment needed.
        return B, 1
    tb = _round_up(pl.cdiv(B, nt), 16)   # balanced, sublane/bf16-pack aligned
    return tb, pl.cdiv(B, tb)


def init_params(key):
    """Logical f32 params mirroring nn.Linear default init (uniform +-1/sqrt(fan_in)).

    Weights are stored (in_features, out_features) = transpose of PyTorch's (out, in).
    """
    def linear(key, fan_in, fan_out):
        kw, kb = jax.random.split(key)
        bound = 1.0 / float(fan_in) ** 0.5
        w = jax.random.uniform(kw, (fan_in, fan_out), jnp.float32, -bound, bound)
        b = jax.random.uniform(kb, (fan_out,), jnp.float32, -bound, bound)
        return w, b

    k1, k2, k3 = jax.random.split(key, 3)
    w1, b1 = linear(k1, IN_F, H1)
    w2, b2 = linear(k2, H1, H2)
    w3, b3 = linear(k3, H2, OUT_F)
    return (w1, b1, w2, b2, w3, b3)


def pack_params(params):
    """Logical f32 params -> bf16 weights / f32 (1, N) biases for the kernel."""
    w1, b1, w2, b2, w3, b3 = params
    return (
        w1.astype(jnp.bfloat16), b1.reshape(1, H1).astype(jnp.float32),
        w2.astype(jnp.bfloat16), b2.reshape(1, H2).astype(jnp.float32),
        w3.astype(jnp.bfloat16), b3.reshape(1, OUT_F).astype(jnp.float32),
    )


def qnetwork_forward(x, packed, *, tb_max=TB_MAX):
    """x: (B, 229) float32. Returns (B, 2) float32 Q-values."""
    w1, b1, w2, b2, w3, b3 = packed
    B = x.shape[0]
    x = x.astype(jnp.float32)
    tb, nt = _choose_batch_tiling(B, tb_max)

    def resident(shape):  # full-array block, constant index map -> stays VMEM-resident
        return pl.BlockSpec(shape, lambda i: (0, 0))

    flops = 2 * B * (IN_F * H1 + H1 * H2 + H2 * OUT_F)
    bytes_accessed = (
        B * IN_F * 4                                     # f32 input tiles
        + (w1.size + w2.size + w3.size) * 2              # bf16 weights (resident)
        + (b1.size + b2.size + b3.size) * 4              # f32 biases
        + B * OUT_F * 4                                  # narrow f32 output
    )

    out = pl.pallas_call(
        qnet_kernel,
        out_shape=jax.ShapeDtypeStruct((B, OUT_F), jnp.float32),
        grid=(nt,),
        in_specs=[
            pl.BlockSpec((tb, IN_F), lambda i: (i, 0)),
            resident((IN_F, H1)), resident((1, H1)),
            resident((H1, H2)), resident((1, H2)),
            resident((H2, OUT_F)), resident((1, OUT_F)),
        ],
        out_specs=pl.BlockSpec((tb, OUT_F), lambda i: (i, 0)),
        compiler_params=pltpu.CompilerParams(
            dimension_semantics=("parallel",),
            vmem_limit_bytes=40 * 1024 * 1024,
        ),
        cost_estimate=pl.CostEstimate(
            flops=flops, transcendentals=0, bytes_accessed=bytes_accessed),
    )(x, w1, b1, w2, b2, w3, b3)
    return out


def reference_forward_f32(x, params):
    """Pure f32 reference matching the original PyTorch module semantics."""
    w1, b1, w2, b2, w3, b3 = params
    h1 = jnp.maximum(x @ w1 + b1, 0.0)
    h2 = jnp.maximum(h1 @ w2 + b2, 0.0)
    return h2 @ w3 + b3


def reference_forward_mimic(x, packed):
    """Reference mirroring the kernel's bf16-operand / f32-accumulate recipe."""
    w1, b1, w2, b2, w3, b3 = packed
    xb = x.astype(jnp.bfloat16)
    h1 = jnp.maximum(
        jnp.dot(xb, w1, preferred_element_type=jnp.float32) + b1, 0.0)
    h2 = jnp.maximum(
        jnp.dot(h1.astype(jnp.bfloat16), w2, preferred_element_type=jnp.float32) + b2, 0.0)
    return jnp.dot(h2.astype(jnp.bfloat16), w3, preferred_element_type=jnp.float32) + b3


if __name__ == "__main__":
    key = jax.random.PRNGKey(0)
    kp, kx1, kx2 = jax.random.split(key, 3)
    params = init_params(kp)
    packed = pack_params(params)

    # Small batch: single full-extent block (block dims == array dims).
    B = 8
    x = jax.random.normal(kx1, (B, IN_F), jnp.float32)
    out = jax.block_until_ready(qnetwork_forward(x, packed))
    assert out.shape == (B, OUT_F)
    assert out.dtype == jnp.float32

    # Tight check against the same bf16/f32 recipe (tiny reassociation slack).
    ref_exact = reference_forward_mimic(x, packed)
    assert jnp.allclose(out, ref_exact, atol=1e-3, rtol=1e-3)

    # Semantic check vs. the original f32 module (loose tolerance for bf16 weights).
    ref_f32 = reference_forward_f32(x, params)
    assert jnp.allclose(out, ref_f32, atol=5e-2, rtol=5e-2)

    # Second run exercising the multi-tile (>=2 grid steps, balanced tiles) and
    # masked partial-last-tile path used for large batches.
    B2 = 40
    x2 = jax.random.normal(kx2, (B2, IN_F), jnp.float32)
    out2 = jax.block_until_ready(qnetwork_forward(x2, packed, tb_max=16))
    assert out2.shape == (B2, OUT_F)
    ref2 = reference_forward_mimic(x2, packed)
    assert jnp.allclose(out2, ref2, atol=1e-3, rtol=1e-3)

    print("KERNEL_OK")
</pallas_src>

<mosaic_0001>
module attributes {stable_mosaic.version = 11 : i64} {
  func.func @qnet_kernel(%arg0: i32, %arg1: memref<8x229xf32, #tpu.memory_space<vmem>>, %arg2: memref<229x256xbf16, #tpu.memory_space<vmem>>, %arg3: memref<1x256xf32, #tpu.memory_space<vmem>>, %arg4: memref<256x128xbf16, #tpu.memory_space<vmem>>, %arg5: memref<1x128xf32, #tpu.memory_space<vmem>>, %arg6: memref<128x2xbf16, #tpu.memory_space<vmem>>, %arg7: memref<1x2xf32, #tpu.memory_space<vmem>>, %arg8: memref<8x2xf32, #tpu.memory_space<vmem>>) attributes {dimension_semantics = [#tpu.dimension_semantics<parallel>], iteration_bounds = array<i64: 1>, scalar_prefetch = 0 : i64, scratch_operands = 0 : i64, tpu.core_type = #tpu.core_type<tc>, window_params = [{transform_indices = @transform_0, window_bounds = array<i64: 8, 229>}, {pipeline_mode = #tpu.pipeline_mode<synchronous>, transform_indices = @transform_1, window_bounds = array<i64: 229, 256>}, {pipeline_mode = #tpu.pipeline_mode<synchronous>, transform_indices = @transform_2, window_bounds = array<i64: 1, 256>}, {pipeline_mode = #tpu.pipeline_mode<synchronous>, transform_indices = @transform_3, window_bounds = array<i64: 256, 128>}, {pipeline_mode = #tpu.pipeline_mode<synchronous>, transform_indices = @transform_4, window_bounds = array<i64: 1, 128>}, {pipeline_mode = #tpu.pipeline_mode<synchronous>, transform_indices = @transform_5, window_bounds = array<i64: 128, 2>}, {pipeline_mode = #tpu.pipeline_mode<synchronous>, transform_indices = @transform_6, window_bounds = array<i64: 1, 2>}, {transform_indices = @transform_7, window_bounds = array<i64: 8, 2>}]} {
    %c0 = arith.constant 0 : index
    %c0_0 = arith.constant 0 : index
    %0 = vector.load %arg1[%c0, %c0_0] : memref<8x229xf32, #tpu.memory_space<vmem>>, vector<8x229xf32>
    %1 = arith.truncf %0 : vector<8x229xf32> to vector<8x229xbf16>
    %c0_1 = arith.constant 0 : index
    %c0_2 = arith.constant 0 : index
    %2 = vector.load %arg2[%c0_1, %c0_2] : memref<229x256xbf16, #tpu.memory_space<vmem>>, vector<229x256xbf16>
    %cst = arith.constant dense<0.000000e+00> : vector<8x256xf32>
    %3 = tpu.matmul %1, %2, %cst {dimension_numbers = #tpu.dot_dimension_numbers<[1], [0], [0], [1], [0, 0, 1, 1], [], []>} : vector<8x229xbf16>, vector<229x256xbf16>, vector<8x256xf32> -> vector<8x256xf32>
    %c0_3 = arith.constant 0 : index
    %c0_4 = arith.constant 0 : index
    %4 = vector.load %arg3[%c0_3, %c0_4] : memref<1x256xf32, #tpu.memory_space<vmem>>, vector<1x256xf32>
    %5 = vector.broadcast %4 : vector<1x256xf32> to vector<8x256xf32>
    %6 = arith.addf %3, %5 : vector<8x256xf32>
    %cst_5 = arith.constant 0.000000e+00 : f32
    %7 = vector.broadcast %cst_5 : f32 to vector<8x256xf32>
    %8 = arith.maximumf %6, %7 : vector<8x256xf32>
    %9 = arith.truncf %8 : vector<8x256xf32> to vector<8x256xbf16>
    %c0_6 = arith.constant 0 : index
    %c0_7 = arith.constant 0 : index
    %10 = vector.load %arg4[%c0_6, %c0_7] : memref<256x128xbf16, #tpu.memory_space<vmem>>, vector<256x128xbf16>
    %cst_8 = arith.constant dense<0.000000e+00> : vector<8x128xf32>
    %11 = tpu.matmul %9, %10, %cst_8 {dimension_numbers = #tpu.dot_dimension_numbers<[1], [0], [0], [1], [0, 0, 1, 1], [], []>} : vector<8x256xbf16>, vector<256x128xbf16>, vector<8x128xf32> -> vector<8x128xf32>
    %c0_9 = arith.constant 0 : index
    %c0_10 = arith.constant 0 : index
    %12 = vector.load %arg5[%c0_9, %c0_10] : memref<1x128xf32, #tpu.memory_space<vmem>>, vector<1x128xf32>
    %13 = vector.broadcast %12 : vector<1x128xf32> to vector<8x128xf32>
    %14 = arith.addf %11, %13 : vector<8x128xf32>
    %cst_11 = arith.constant 0.000000e+00 : f32
    %15 = vector.broadcast %cst_11 : f32 to vector<8x128xf32>
    %16 = arith.maximumf %14, %15 : vector<8x128xf32>
    %17 = arith.truncf %16 : vector<8x128xf32> to vector<8x128xbf16>
    %c0_12 = arith.constant 0 : index
    %c0_13 = arith.constant 0 : index
    %18 = vector.load %arg6[%c0_12, %c0_13] : memref<128x2xbf16, #tpu.memory_space<vmem>>, vector<128x2xbf16>
    %cst_14 = arith.constant dense<0.000000e+00> : vector<8x2xf32>
    %19 = tpu.matmul %17, %18, %cst_14 {dimension_numbers = #tpu.dot_dimension_numbers<[1], [0], [0], [1], [0, 0, 1, 1], [], []>} : vector<8x128xbf16>, vector<128x2xbf16>, vector<8x2xf32> -> vector<8x2xf32>
    %c0_15 = arith.constant 0 : index
    %c0_16 = arith.constant 0 : index
    %20 = vector.load %arg7[%c0_15, %c0_16] : memref<1x2xf32, #tpu.memory_space<vmem>>, vector<1x2xf32>
    %21 = vector.broadcast %20 : vector<1x2xf32> to vector<8x2xf32>
    %22 = arith.addf %19, %21 : vector<8x2xf32>
    %c0_17 = arith.constant 0 : index
    %c0_18 = arith.constant 0 : index
    %23 = vector.load %arg8[%c0_17, %c0_18] : memref<8x2xf32, #tpu.memory_space<vmem>>, vector<8x2xf32>
    tpu.vector_store %arg8[%c0_17, %c0_18], %22 {strides = array<i32>} : memref<8x2xf32, #tpu.memory_space<vmem>>, vector<8x2xf32>,
    return
  }
  func.func @transform_0(%arg0: i32) -> (i32, i32) {
    %c0_i32 = arith.constant 0 : i32
    %c0_i32_0 = arith.constant 0 : i32
    return %arg0, %c0_i32 : i32, i32
  }
  func.func @transform_1(%arg0: i32) -> (i32, i32) {
    %c0_i32 = arith.constant 0 : i32
    %c0_i32_0 = arith.constant 0 : i32
    %c0_i32_1 = arith.constant 0 : i32
    return %c0_i32, %c0_i32_0 : i32, i32
  }
  func.func @transform_2(%arg0: i32) -> (i32, i32) {
    %c0_i32 = arith.constant 0 : i32
    %c0_i32_0 = arith.constant 0 : i32
    %c0_i32_1 = arith.constant 0 : i32
    return %c0_i32, %c0_i32_0 : i32, i32
  }
  func.func @transform_3(%arg0: i32) -> (i32, i32) {
    %c0_i32 = arith.constant 0 : i32
    %c0_i32_0 = arith.constant 0 : i32
    %c0_i32_1 = arith.constant 0 : i32
    return %c0_i32, %c0_i32_0 : i32, i32
  }
  func.func @transform_4(%arg0: i32) -> (i32, i32) {
    %c0_i32 = arith.constant 0 : i32
    %c0_i32_0 = arith.constant 0 : i32
    %c0_i32_1 = arith.constant 0 : i32
    return %c0_i32, %c0_i32_0 : i32, i32
  }
  func.func @transform_5(%arg0: i32) -> (i32, i32) {
    %c0_i32 = arith.constant 0 : i32
    %c0_i32_0 = arith.constant 0 : i32
    %c0_i32_1 = arith.constant 0 : i32
    return %c0_i32, %c0_i32_0 : i32, i32
  }
  func.func @transform_6(%arg0: i32) -> (i32, i32) {
    %c0_i32 = arith.constant 0 : i32
    %c0_i32_0 = arith.constant 0 : i32
    %c0_i32_1 = arith.constant 0 : i32
    return %c0_i32, %c0_i32_0 : i32, i32
  }
  func.func @transform_7(%arg0: i32) -> (i32, i32) {
    %c0_i32 = arith.constant 0 : i32
    %c0_i32_0 = arith.constant 0 : i32
    return %arg0, %c0_i32 : i32, i32
  }
}

</mosaic_0001>

<bundles_post_ra>
// kernel: tpu_custom_call.1
= control target key start
LH: loop header
LB: loop body
LE: loop exit
PB: predicated region body
PF: predicated region fallthrough
CT: control target
= control target key end

     0   :  { %12 = vsyncpa [#allocation3], 0  ;;  %s948_s0 = inlined_call_operand.vmem [shape: f32[8,229], index: 0, kind: input, shape index: {}]   ;;  %s949_s1 = inlined_call_operand.hbm [shape: bf16[229,256], index: 1, kind: input, shape index: {}]   ;;  %s950_s2 = inlined_call_operand.vmem [shape: f32[1,256], index: 2, kind: input, shape index: {}]   ;;  %s951_s3 = inlined_call_operand.hbm [shape: bf16[256,128], index: 3, kind: input, shape index: {}]   ;;  %s952_s4 = inlined_call_operand.vmem [shape: f32[1,128], index: 4, kind: input, shape index: {}]   ;;  %s953_s5 = inlined_call_operand.vmem [shape: bf16[128,2], index: 5, kind: input, shape index: {}]   ;;  %s954_s6 = inlined_call_operand.vmem [shape: f32[1,2], index: 6, kind: input, shape index: {}]   ;;  %s955_s7 = inlined_call_operand.vmem [shape: f32[8,2], index: 7, kind: output, shape index: {}]  }
   0x1   :  { %13 = vsyncpa [#allocation5], 0  ;;  %s833_s24 = smov [#allocation2]   ;;  %s785_s28 = scalar_lea.hbm %s949_s1, 3712 }
   0x2   :  { %s21_s25 = sshll.u32 %s833_s24, 4  ;;  %p786_p0 = scmp.ne.s32.totalorder %s949_s1, %s785_s28  ;;  %s22_s25 = int_to_ptr.vmem [resolvable:$true] %s21_s25 }
   0x3   :  { %p789_p1 = scmp.lt.u32.totalorder %s785_s28, %s949_s1 }
   0x5   :  { %p791_p2 = pnand %p789_p1, %p786_p0 }
   0x7   :  { %794 = shalt.err (!%p791_p2)
}
   0x8   :  { %s795_s10 = scalar_lea.vmem %s22_s25, 3712  ;;  %p800_p4 = scmp.lt.s32.totalorder %s22_s25, %s22_s25 }
   0x9   :  { %p796_p3 = scmp.ne.s32.totalorder %s22_s25, %s795_s10  ;;  %p801_p5 = scmp.lt.s32.totalorder %s795_s10, %s795_s10 }
   0xb   :  { %p802_p6 = por %p801_p5, %p800_p4 }
   0xd   :  { %p803_p7 = pnand %p802_p6, %p796_p3 }
   0xf   :  { %806 = shalt.err (!%p803_p7)
}
  0x10   :  { %s834_s11 = smov 128   ;;  %s835_s12 = smov 8  }
  0x11   :  { %27 = dma.hbm_to_vmem [thread:$0]  %s949_s1, 3712, %s22_s25, [#allocation3], %s834_s11, %s834_s11, %s835_s12  }
  0x12   :  { %s836_s15 = smov [#allocation4]   ;;  %s807_s19 = scalar_lea.hbm %s951_s3, 2048 }
  0x13   :  { %s35_s16 = sshll.u32 %s836_s15, 4  ;;  %p808_p8 = scmp.ne.s32.totalorder %s951_s3, %s807_s19  ;;  %s36_s16 = int_to_ptr.vmem [resolvable:$true] %s35_s16 }
  0x14   :  { %p811_p9 = scmp.lt.u32.totalorder %s807_s19, %s951_s3 }
  0x16   :  { %p813_p10 = pnand %p811_p9, %p808_p8 }
  0x18   :  { %816 = shalt.err (!%p813_p10)
}
  0x19   :  { %s817_s24 = scalar_lea.vmem %s36_s16, 2048  ;;  %p822_p12 = scmp.lt.s32.totalorder %s36_s16, %s36_s16 }
  0x1a   :  { %p818_p11 = scmp.ne.s32.totalorder %s36_s16, %s817_s24  ;;  %p823_p13 = scmp.lt.s32.totalorder %s817_s24, %s817_s24 }
  0x1c   :  { %p824_p0 = por %p823_p13, %p822_p12 }
  0x1e   :  { %p825_p1 = pnand %p824_p0, %p818_p11 }
  0x20   :  { %828 = shalt.err (!%p825_p1)
}
  0x21   :  { %s837_s1 = smov 64   ;;  %s838_s25 = smov 4  }
  0x22   :  { %41 = dma.hbm_to_vmem [thread:$0]  %s951_s3, 2048, %s36_s16, [#allocation5], %s837_s1, %s837_s1, %s838_s25  }
  0x23   :  { %829 = dma.done.wait [#allocation3], 3712  }
  0x24   :  { %830 = vsyncadd [#allocation3], 4294963584 }
  0x25   :  { %831 = dma.done.wait [#allocation5], 2048  }
  0x26   :  { %832 = vsyncadd [#allocation5], 4294965248  ;;  %v717_v0 = vld [vmem:[#allocation2 + $0x4] ss:$8 sps:$4 sm:$0xff]   ;;  %v719_v1 = vld [vmem:[#allocation2] ss:$8 sps:$4 sm:$0xff]   ;;  %v90_v57 = vlaneseq }
  0x27   :  { %259 = vmatprep.subr.bf16.mxu0 %v717_v0  ;;  %v720_v2 = vld [vmem:[#allocation2 + $0x14] ss:$8 sps:$4 sm:$0xff]   ;;  %v722_v3 = vld [vmem:[#allocation2 + $0x10] ss:$8 sps:$4 sm:$0xff]   ;;  %v723_v4 = vld [vmem:[#allocation2 + $0x24] ss:$8 sps:$4 sm:$0xff]  }
  0x28   :  { %260 = vmatpush1.bf16.msra.mxu0 %v719_v1  ;;  %v725_v5 = vld [vmem:[#allocation2 + $0x20] ss:$8 sps:$4 sm:$0xff]   ;;  %v726_v6 = vld [vmem:[#allocation2 + $0x34] ss:$8 sps:$4 sm:$0xff]   ;;  %v728_v7 = vld [vmem:[#allocation2 + $0x30] ss:$8 sps:$4 sm:$0xff]  }
  0x29   :  { %261 = vmatprep.subr.bf16.mxu0 %v720_v2  ;;  %v729_v8 = vld [vmem:[#allocation2 + $0x44] ss:$8 sps:$4 sm:$0xff]   ;;  %v731_v9 = vld [vmem:[#allocation2 + $0x40] ss:$8 sps:$4 sm:$0xff]   ;;  %v732_v10 = vld [vmem:[#allocation2 + $0x54] ss:$8 sps:$4 sm:$0xff]  }
  0x2a   :  { %v734_v11 = vld [vmem:[#allocation2 + $0x50] ss:$8 sps:$4 sm:$0xff]   ;;  %v735_v12 = vld [vmem:[#allocation2 + $0x64] ss:$8 sps:$4 sm:$0xff]   ;;  %vm245_vm0 = vcmask 826368   ;;  %vm249_vm1 = vcmask 1041408  }
  0x2b   :  { %v56_v13 = vld [vmem:[%s948_s0 + $0x8] sm:$0xff]  ;;  %v738_v18 = vld [vmem:[#allocation2 + $0x74] ss:$8 sps:$4 sm:$0xff]   ;;  %v740_v22 = vld [vmem:[#allocation2 + $0x70] ss:$8 sps:$4 sm:$0xff]   ;;  %vm250_vm2 = vcmask 1042432  }
  0x2c   :  { %262 = vmatpush1.bf16.msra.mxu0 %v722_v3  ;;  %v58_v14 = vpack.c.bf16 %v56_v13, %v56_v13  ;;  %v761_v15 = vld [vmem:[#allocation4 + $0x40] sm:$0xff]   ;;  %v763_v19 = vld [vmem:[#allocation4 + $0x48] sm:$0xff]   ;;  %v765_v21 = vld [vmem:[#allocation4 + $0x50] sm:$0xff]   ;;  %v839_v40 = vmov 65535   ;;  %v840_v56 = vmov 0.0   ;;  %v91_v58 = vshrl.u32 %v90_v57, 7 }
  0x2d   :  { %263 = vmatprep.subr.bf16.mxu0 %v723_v4  ;;  %v737_v16 = vld [vmem:[#allocation2 + $0x60] ss:$8 sps:$4 sm:$0xff]   ;;  %657 = vmatprep.subr.bf16.mxu1 %v761_v15  ;;  %v764_v20 = vld [vmem:[#allocation4 + $0x8] sm:$0xff]   ;;  %v741_v23 = vld [vmem:[#allocation2 + $0x84] ss:$8 sps:$4 sm:$0xff]   ;;  %v251_v41 = vsel %vm249_vm1, 4294967295, %v839_v40 }
  0x2e   :  { %v762_v17 = vld [vmem:[#allocation4] sm:$0xff]   ;;  %630 = vmatprep.mubr.msk.bf16.mxu0 %vm245_vm0, %v58_v14  ;;  %v766_v24 = vld [vmem:[#allocation4 + $0x10] sm:$0xff]   ;;  %v767_v25 = vld [vmem:[#allocation4 + $0x58] sm:$0xff]   ;;  %v252_v45 = vsel %vm250_vm2, %v251_v41, 0  ;;  %v92_v59 = vsub.s32 0, %v91_v58  ;;  %v96_v61 = vsub.s32 1, %v91_v58 }
  0x2f   :  { %658 = vmatpush3.bf16.msra.mxu1 %v762_v17  ;;  %v743_v26 = vld [vmem:[#allocation2 + $0x80] ss:$8 sps:$4 sm:$0xff]   ;;  %v744_v27 = vld [vmem:[#allocation2 + $0x94] ss:$8 sps:$4 sm:$0xff]   ;;  %v746_v30 = vld [vmem:[#allocation2 + $0x90] ss:$8 sps:$4 sm:$0xff]  }
  0x30   :  { %264 = vmatpush1.bf16.msra.mxu0 %v725_v5  ;;  %659 = vmatprep.subr.bf16.mxu1 %v763_v19  ;;  %v768_v28 = vld [vmem:[#allocation4 + $0x18] sm:$0xff]   ;;  %v769_v29 = vld [vmem:[#allocation4 + $0x60] sm:$0xff]   ;;  %v771_v33 = vld [vmem:[#allocation4 + $0x68] sm:$0xff]   ;;  %vm841_vm3 = vmmov 0   ;;  %vm592_vm4 = vcmask 15360  }
  0x31   :  { %265 = vmatprep.subr.bf16.mxu0 %v726_v6  ;;  %v770_v31 = vld [vmem:[#allocation4 + $0x20] sm:$0xff]   ;;  %v772_v35 = vld [vmem:[#allocation4 + $0x28] sm:$0xff]   ;;  %v87_v39 = vld [vmem:[#allocation2 + $0xe0] sm:$0x77] }
  0x32   :  { %v747_v32 = vld [vmem:[#allocation2 + $0xa4] ss:$8 sps:$4 sm:$0xff]   ;;  %v749_v34 = vld [vmem:[#allocation2 + $0xa0] ss:$8 sps:$4 sm:$0xff]   ;;  %v750_v36 = vld [vmem:[#allocation2 + $0xb4] ss:$8 sps:$4 sm:$0xff]   ;;  %v629_v44 = vcombine.high %v87_v39, %v87_v39  ;;  %v628_v47 = vcombine.low %v87_v39, %v87_v39 }
  0x33   :  { %660 = vmatpush3.bf16.msra.mxu1 %v764_v20  ;;  %v752_v37 = vld [vmem:[#allocation2 + $0xb0] ss:$8 sps:$4 sm:$0xff]   ;;  %v753_v38 = vld [vmem:[#allocation2 + $0xc4] ss:$8 sps:$4 sm:$0xff]   ;;  %v755_v42 = vld [vmem:[#allocation2 + $0xc0] ss:$8 sps:$4 sm:$0xff]  }
  0x34   :  { %266 = vmatpush1.bf16.msra.mxu0 %v728_v7  ;;  %661 = vmatprep.subr.bf16.mxu1 %v765_v21  ;;  %v756_v43 = vld [vmem:[#allocation2 + $0xd4] ss:$8 sps:$4 sm:$0xff]   ;;  %v758_v46 = vld [vmem:[#allocation2 + $0xd0] ss:$8 sps:$4 sm:$0xff]   ;;  %v257_v48 = vand.u32 %v629_v44, %v252_v45  ;;  %v254_v49 = vand.u32 %v628_v47, %v252_v45  ;;  %v55_v50 = vld [vmem:[%s948_s0] sm:$0xff] }
  0x35   :  { %267 = vmatprep.subr.bf16.mxu0 %v729_v8  ;;  %v57_v51 = vpack.c.bf16 %v55_v50, %v55_v50  ;;  %v773_v52 = vld [vmem:[#allocation4 + $0x70] sm:$0xff]   ;;  %v775_v54 = vld [vmem:[#allocation4 + $0x78] sm:$0xff]   ;;  %v782_v15 = vld [vmem:[%s953_s5 + $0x28] sm:$0xff]  }
  0x36   :  { %v774_v53 = vld [vmem:[#allocation4 + $0x30] sm:$0xff]   ;;  %v776_v55 = vld [vmem:[#allocation4 + $0x38] sm:$0xff]  }
  0x37   :  { %662 = vmatpush3.bf16.msra.mxu1 %v766_v24  ;;  %v88_v60 = vld [vmem:[%s950_s2] sm:$0x3]  ;;  %v780_v13 = vld [vmem:[%s953_s5 + $0x18] sm:$0xff]  }
  0x38   :  { %268 = vmatpush1.bf16.msra.mxu0 %v731_v9  ;;  %663 = vmatprep.subr.bf16.mxu1 %v767_v25  ;;  %v93_v62 = vrot.slane %v88_v60, %v92_v59  ;;  %v97_v63 = vrot.slane %v88_v60, %v96_v61  ;;  %v777_v9 = vld [vmem:[%s953_s5] sm:$0xff]   ;;  %v784_v17 = vld [vmem:[%s953_s5 + $0x38] sm:$0xff]  }
  0x39   :  { %269 = vmatprep.subr.bf16.mxu0 %v732_v10  ;;  %v781_v14 = vld [vmem:[%s953_s5 + $0x20] sm:$0xff]  }
  0x3a   :  { %v631_v19 = vld [vmem:[%s952_s4] ss:$0 sm:$0xff] }
  0x3b   :  { %664 = vmatpush3.bf16.msra.mxu1 %v768_v28 }
  0x3c   :  { %270 = vmatpush1.bf16.msra.mxu0 %v734_v11  ;;  %665 = vmatprep.subr.bf16.mxu1 %v769_v29  ;;  %v778_v11 = vld [vmem:[%s953_s5 + $0x8] sm:$0xff]  }
  0x3d   :  { %271 = vmatprep.subr.bf16.mxu0 %v735_v12  ;;  %v779_v12 = vld [vmem:[%s953_s5 + $0x10] sm:$0xff]  }
  0x3f   :  { %666 = vmatpush3.bf16.msra.mxu1 %v770_v31 }
  0x40   :  { %272 = vmatpush1.bf16.msra.mxu0 %v737_v16  ;;  %667 = vmatprep.subr.bf16.mxu1 %v771_v33  ;;  %v783_v16 = vld [vmem:[%s953_s5 + $0x30] sm:$0xff]  }
  0x41   :  { %273 = vmatprep.subr.bf16.mxu0 %v738_v18 }
  0x43   :  { %668 = vmatpush3.bf16.msra.mxu1 %v772_v35 }
  0x44   :  { %274 = vmatpush1.bf16.msra.mxu0 %v740_v22  ;;  %669 = vmatprep.subr.bf16.mxu1 %v773_v52 }
  0x45   :  { %275 = vmatprep.subr.bf16.mxu0 %v741_v23 }
  0x47   :  { %670 = vmatpush3.bf16.msra.mxu1 %v774_v53 }
  0x48   :  { %276 = vmatpush1.bf16.msra.mxu0 %v743_v26  ;;  %671 = vmatprep.subr.bf16.mxu1 %v775_v54 }
  0x49   :  { %277 = vmatprep.subr.bf16.mxu0 %v744_v27  ;;  %v648_v27 = vld [vmem:[%s954_s6] ss:$0 sm:$0xff] }
  0x4b   :  { %672 = vmatpush3.bf16.msra.mxu1 %v776_v55 }
  0x4c   :  { %278 = vmatpush1.bf16.msra.mxu0 %v746_v30  ;;  %688 = vmatprep.subr.bf16.mxu1 %v840_v56 }
  0x4d   :  { %279 = vmatprep.subr.bf16.mxu0 %v747_v32 }
  0x50   :  { %280 = vmatpush1.bf16.msra.mxu0 %v749_v34 }
  0x51   :  { %281 = vmatprep.subr.bf16.mxu0 %v750_v36 }
  0x54   :  { %282 = vmatpush1.bf16.msra.mxu0 %v752_v37 }
  0x55   :  { %283 = vmatprep.subr.bf16.mxu0 %v753_v38 }
  0x58   :  { %284 = vmatpush1.bf16.msra.mxu0 %v755_v42 }
  0x59   :  { %285 = vmatprep.subr.bf16.mxu0 %v756_v43 }
  0x5c   :  { %286 = vmatpush1.bf16.msra.mxu0 %v758_v46 }
  0x5d   :  { %287 = vmatprep.subr.bf16.mxu0 %v257_v48 }
  0x60   :  { %288 = vmatpush1.bf16.msra.mxu0 %v254_v49 }
  0x63   :  { %292 = vmatmul.mubr.bf16.vlgmr.msra.gmra.mrb[0].mxu0 %v57_v51 }
 0x136   :  { %v293_v0 = vpop.f32.mrb[0].mxu0 }
 0x137   :  { %v294_v1 = vadd.f32 %v293_v0, %v93_v62  ;;  %v295_v2 = vpop.f32.mrb[1].mxu0 }
 0x138   :  { %v296_v3 = vadd.f32 %v295_v2, %v97_v63  ;;  %v297_v4 = vpop.f32.mrb[2].mxu0 }
 0x139   :  { %v300_v5 = vmax.f32 %v294_v1, 0.0  ;;  %v298_v6 = vpop.f32.mrb[3].mxu0 }
 0x13a   :  { %v301_v7 = vmax.f32 %v296_v3, 0.0 }
 0x13b   :  { %v302_v10 = vpack.c.bf16 %v300_v5, %v300_v5 }
 0x13c   :  { %v303_v8 = vpack.c.bf16 %v301_v7, %v301_v7 }
 0x13e   :  { %471 = vmatprep.mubr.bf16.mxu1 %v303_v8 }
 0x13f   :  { %472 = vmatmul.mubr.bf16.vlgmr.msra.gmra.mrb[0].mxu1 %v302_v10 }
 0x140   :  { %689 = vmatpush3.bf16.msra.mxu1 %v777_v9  ;;  %704 = vmatprep.mubr.msk.bf16.mxu1 %vm841_vm3, %v840_v56 }
 0x141   :  { %690 = vmatprep.subr.bf16.mxu1 %v840_v56 }
 0x144   :  { %691 = vmatpush3.bf16.msra.mxu1 %v778_v11 }
 0x145   :  { %692 = vmatprep.subr.bf16.mxu1 %v840_v56 }
 0x148   :  { %693 = vmatpush3.bf16.msra.mxu1 %v779_v12 }
 0x149   :  { %694 = vmatprep.subr.bf16.mxu1 %v840_v56 }
 0x14c   :  { %695 = vmatpush3.bf16.msra.mxu1 %v780_v13 }
 0x14d   :  { %696 = vmatprep.subr.bf16.mxu1 %v840_v56 }
 0x150   :  { %697 = vmatpush3.bf16.msra.mxu1 %v781_v14 }
 0x151   :  { %698 = vmatprep.subr.bf16.mxu1 %v840_v56 }
 0x154   :  { %699 = vmatpush3.bf16.msra.mxu1 %v782_v15 }
 0x155   :  { %700 = vmatprep.subr.bf16.mxu1 %v840_v56 }
 0x158   :  { %701 = vmatpush3.bf16.msra.mxu1 %v783_v16 }
 0x159   :  { %702 = vmatprep.subr.bf16.mxu1 %v840_v56 }
 0x15c   :  { %703 = vmatpush3.bf16.msra.mxu1 %v784_v17 }
 0x212   :  { %v673_v18 = vpop.f32.mrb[0].mxu1 }
 0x213   :  { %v674_v20 = vpop.f32.mrb[1].mxu1 }
 0x214   :  { %v675_v21 = vadd.f32 %v674_v20, %v673_v18  ;;  %v676_v22 = vpop.f32.mrb[2].mxu1 }
 0x215   :  { %v677_v23 = vpop.f32.mrb[3].mxu1 }
 0x216   :  { %v474_v24 = vadd.f32 %v675_v21, %v631_v19 }
 0x218   :  { %v479_v25 = vmax.f32 %v474_v24, 0.0 }
 0x21a   :  { %v480_v26 = vpack.c.bf16 %v479_v25, %v479_v25 }
 0x21c   :  { %705 = vmatmul.mubr.bf16.vlgmr.msra.gmra.mrb[4].mxu1 %v480_v26 }
 0x2ef   :  { %v586_v28 = vpop.f32.mrb[4].mxu1 }
 0x2f0   :  { %v587_v29 = vadd.f32 %v648_v27, %v586_v28  ;;  %v706_v30 = vpop.f32.mrb[5].mxu1 }
 0x2f1   :  { %v589_v31 = vpop.f32.mrb[6].mxu1 }
 0x2f2   :  { %593 = vst.msk [vmem:[%s955_s7] sm:$0xff] %vm592_vm4, %v587_v29  ;;  %v707_v32 = vpop.f32.mrb[7].mxu1 }
 0x2f3   :  { %598 = vsyncpa [#allocation3], 1 }
 0x2f4   :  { %599 = vsyncpa [#allocation5], 1 }

</bundles_post_ra>
